<compile_context>
chip_gen: v7x
topology: tpu7x:2x2x1
jax: 0.10.0
libtpu: 0.0.40
codegen_flags: <defaults>
</compile_context>

<pallas_src>
import math
from functools import partial

import jax
import jax.numpy as jnp
from jax.experimental import pallas as pl
from jax.experimental.pallas import tpu as pltpu

_BN_EPS = 1e-5
_SUBLANE = 8
_TN_MAX = 8192   # safe on all generations with trimmed in/out widths


def _round_up(x, m):
    return ((x + m - 1) // m) * m


def _fused_mlp_kernel(x_ref, *refs, num_layers):
    # refs layout: w_0, b_0, w_1, b_1, ..., w_{L-1}, b_{L-1}, o_ref
    # x_ref: (TN, Din)          VMEM (real width, no lane padding)
    # w_i:   (Din_i, Dout_i)    VMEM bf16 (BN-folded, transposed, Dout padded to 8)
    # b_i:   (1, Dout_i)        VMEM f32  (BN-folded)
    # o_ref: (TN, Dout_last)    VMEM f32  (Dout_last = 8)
    o_ref = refs[-1]
    h = x_ref[...]
    for i in range(num_layers):  # unrolled at trace time (static layer count)
        w = refs[2 * i][...]
        b = refs[2 * i + 1][...]
        # bf16 MXU feed, f32 accumulation, f32 bias + ReLU epilogue.
        h = jnp.dot(h.astype(jnp.bfloat16), w, preferred_element_type=jnp.float32)
        h = jnp.maximum(h + b, 0.0)  # padded cols: 0-weight, 0-bias, ReLU -> stay 0
    o_ref[...] = h


def init_deepsurv_params(key, in_channel, hidden_dims):
    """Parameter init matching the shapes of the torch module (torch-style layout)."""
    dims = [in_channel] + list(hidden_dims) + [1]
    params = []
    for i in range(len(dims) - 1):
        d_in, d_out = dims[i], dims[i + 1]
        key, kw, kb, kg, kbe, km, kv = jax.random.split(key, 7)
        bound = 1.0 / math.sqrt(d_in)  # torch nn.Linear default init range
        w = jax.random.uniform(kw, (d_out, d_in), jnp.float32, -bound, bound)
        b = jax.random.uniform(kb, (d_out,), jnp.float32, -bound, bound)
        # Non-trivial BN params so the fold is actually exercised.
        gamma = 1.0 + 0.1 * jax.random.normal(kg, (d_out,), jnp.float32)
        beta = 0.1 * jax.random.normal(kbe, (d_out,), jnp.float32)
        running_mean = 0.1 * jax.random.normal(km, (d_out,), jnp.float32)
        running_var = 1.0 + 0.1 * jax.random.uniform(kv, (d_out,), jnp.float32)
        params.append(dict(w=w, b=b, gamma=gamma, beta=beta,
                           mean=running_mean, var=running_var))
    return params


def prepare_params(params):
    """One-time fold of BN(eval) into Linear, transpose to (Din, Dout), pad Dout to 8,
    cast weights to bf16 for the MXU (biases stay f32 for the epilogue)."""
    ws, bs = [], []
    prev_pad = None  # padded output width of the previous layer (None => raw x width)
    for p in params:
        scale = p["gamma"] * jax.lax.rsqrt(p["var"] + _BN_EPS)          # (d_out,)
        w_f = (p["w"].astype(jnp.float32) * scale[:, None]).T           # (d_in, d_out)
        b_f = (p["b"] - p["mean"]) * scale + p["beta"]                  # (d_out,)
        d_in, d_out = w_f.shape
        in_rows = d_in if prev_pad is None else prev_pad                # chain padding
        p_out = _round_up(d_out, _SUBLANE)
        wp = jnp.zeros((in_rows, p_out), jnp.float32).at[:d_in, :d_out].set(w_f)
        bp = jnp.zeros((1, p_out), jnp.float32).at[0, :d_out].set(b_f.astype(jnp.float32))
        ws.append(wp.astype(jnp.bfloat16))
        bs.append(bp)
        prev_pad = p_out
    return {"w": ws, "b": bs}


def _pick_tile(n):
    """Batch tile: multiple of 8; >= 2 grid steps once the batch is non-trivial so
    both v7x TensorCores participate; capped so per-step VMEM stays tiny."""
    if n <= 64:
        return _round_up(max(n, 1), _SUBLANE)
    return min(_TN_MAX, _round_up(pl.cdiv(n, 2), _SUBLANE))


@jax.jit
def deepsurv_forward(x, prepared):
    """Fused eval-mode forward. x: (N, in_channel) f32 or bf16. Returns (N, 1) f32."""
    ws, bs = prepared["w"], prepared["b"]
    num_layers = len(ws)
    n, d_in = x.shape
    assert d_in == ws[0].shape[0], (d_in, ws[0].shape)
    p_last = ws[-1].shape[1]

    tn = _pick_tile(n)
    grid = (pl.cdiv(n, tn),)

    in_specs = [pl.BlockSpec((tn, d_in), lambda i: (i, 0))]
    operands = [x]
    for w, b in zip(ws, bs):
        # Weights/biases: full-array blocks, same block every grid step
        # (VMEM-resident across the batch loop).
        in_specs.append(pl.BlockSpec(w.shape, lambda i: (0, 0)))
        in_specs.append(pl.BlockSpec(b.shape, lambda i: (0, 0)))
        operands.append(w)
        operands.append(b)

    out = pl.pallas_call(
        partial(_fused_mlp_kernel, num_layers=num_layers),
        out_shape=jax.ShapeDtypeStruct((n, p_last), jnp.float32),
        grid=grid,
        in_specs=in_specs,
        out_specs=pl.BlockSpec((tn, p_last), lambda i: (i, 0)),
        compiler_params=pltpu.CompilerParams(
            dimension_semantics=("parallel",),  # v7x: split batch across 2 TCs
        ),
    )(*operands)

    return out[:, :1]


def _reference_forward_f32(x, params):
    """Pure-JAX f32 eval-mode reference (Linear -> BN(running stats) -> ReLU)."""
    h = x.astype(jnp.float32)
    for p in params:
        y = h @ p["w"].T + p["b"]
        y = (y - p["mean"]) * jax.lax.rsqrt(p["var"] + _BN_EPS) * p["gamma"] + p["beta"]
        h = jnp.maximum(y, 0.0)
    return h


def _reference_forward_bf16(x, prepared):
    """Pure-JAX reference using the exact same folded bf16 weights / f32 epilogue."""
    h = x
    for w, b in zip(prepared["w"], prepared["b"]):
        h = jnp.dot(h.astype(jnp.bfloat16), w, preferred_element_type=jnp.float32)
        h = jnp.maximum(h + b, 0.0)
    return h[:, :1]


if __name__ == "__main__":
    key = jax.random.PRNGKey(0)
    key, kx, kx2 = jax.random.split(key, 3)

    batch = 8
    in_channel = 16
    hidden_dims = [32, 32]   # network dims become [16, 32, 32, 1]

    x = jax.random.normal(kx, (batch, in_channel), dtype=jnp.float32)
    params = init_deepsurv_params(key, in_channel, hidden_dims)
    prepared = prepare_params(params)

    out = jax.block_until_ready(deepsurv_forward(x, prepared))

    ref_f32 = jax.block_until_ready(_reference_forward_f32(x, params))
    ref_bf16 = jax.block_until_ready(_reference_forward_bf16(x, prepared))

    assert out.shape == (batch, 1), out.shape
    assert out.dtype == jnp.float32
    assert bool(jnp.all(jnp.isfinite(out)))
    assert bool(jnp.all(out >= 0.0))   # final BN+ReLU (matches the module as written)
    # Tight check vs an op-for-op bf16 emulation, loose check vs the f32 module ref.
    assert bool(jnp.allclose(out, ref_bf16, atol=1e-4, rtol=1e-4)), (out, ref_bf16)
    assert bool(jnp.allclose(out, ref_f32[:, :1], atol=5e-2, rtol=5e-2)), (out, ref_f32)

    # Second shape: exercises the multi-step grid (v7x megacore path) and a masked
    # partial last tile (n not a multiple of tn), with no wrapper-side padding.
    n2 = 300
    x2 = jax.random.normal(kx2, (n2, in_channel), dtype=jnp.float32)
    out2 = jax.block_until_ready(deepsurv_forward(x2, prepared))
    ref2 = jax.block_until_ready(_reference_forward_bf16(x2, prepared))
    assert out2.shape == (n2, 1)
    assert bool(jnp.allclose(out2, ref2, atol=1e-4, rtol=1e-4))

    print("KERNEL_OK")
</pallas_src>

<mosaic_0001>
module attributes {stable_mosaic.version = 11 : i64} {
  func.func @_fused_mlp_kernel(%arg0: i32, %arg1: memref<8x16xf32, #tpu.memory_space<vmem>>, %arg2: memref<16x32xbf16, #tpu.memory_space<vmem>>, %arg3: memref<1x32xf32, #tpu.memory_space<vmem>>, %arg4: memref<32x32xbf16, #tpu.memory_space<vmem>>, %arg5: memref<1x32xf32, #tpu.memory_space<vmem>>, %arg6: memref<32x8xbf16, #tpu.memory_space<vmem>>, %arg7: memref<1x8xf32, #tpu.memory_space<vmem>>, %arg8: memref<8x8xf32, #tpu.memory_space<vmem>>) attributes {dimension_semantics = [#tpu.dimension_semantics<parallel>], iteration_bounds = array<i64: 1>, scalar_prefetch = 0 : i64, scratch_operands = 0 : i64, tpu.core_type = #tpu.core_type<tc>, window_params = [{transform_indices = @transform_0, window_bounds = array<i64: 8, 16>}, {pipeline_mode = #tpu.pipeline_mode<synchronous>, transform_indices = @transform_1, window_bounds = array<i64: 16, 32>}, {pipeline_mode = #tpu.pipeline_mode<synchronous>, transform_indices = @transform_2, window_bounds = array<i64: 1, 32>}, {pipeline_mode = #tpu.pipeline_mode<synchronous>, transform_indices = @transform_3, window_bounds = array<i64: 32, 32>}, {pipeline_mode = #tpu.pipeline_mode<synchronous>, transform_indices = @transform_4, window_bounds = array<i64: 1, 32>}, {pipeline_mode = #tpu.pipeline_mode<synchronous>, transform_indices = @transform_5, window_bounds = array<i64: 32, 8>}, {pipeline_mode = #tpu.pipeline_mode<synchronous>, transform_indices = @transform_6, window_bounds = array<i64: 1, 8>}, {transform_indices = @transform_7, window_bounds = array<i64: 8, 8>}]} {
    %c0 = arith.constant 0 : index
    %c0_0 = arith.constant 0 : index
    %0 = vector.load %arg1[%c0, %c0_0] : memref<8x16xf32, #tpu.memory_space<vmem>>, vector<8x16xf32>
    %c0_1 = arith.constant 0 : index
    %c0_2 = arith.constant 0 : index
    %1 = vector.load %arg2[%c0_1, %c0_2] : memref<16x32xbf16, #tpu.memory_space<vmem>>, vector<16x32xbf16>
    %c0_3 = arith.constant 0 : index
    %c0_4 = arith.constant 0 : index
    %2 = vector.load %arg3[%c0_3, %c0_4] : memref<1x32xf32, #tpu.memory_space<vmem>>, vector<1x32xf32>
    %3 = arith.truncf %0 : vector<8x16xf32> to vector<8x16xbf16>
    %cst = arith.constant dense<0.000000e+00> : vector<8x32xf32>
    %4 = tpu.matmul %3, %1, %cst {dimension_numbers = #tpu.dot_dimension_numbers<[1], [0], [0], [1], [0, 0, 1, 1], [], []>} : vector<8x16xbf16>, vector<16x32xbf16>, vector<8x32xf32> -> vector<8x32xf32>
    %5 = vector.broadcast %2 : vector<1x32xf32> to vector<8x32xf32>
    %6 = arith.addf %4, %5 : vector<8x32xf32>
    %cst_5 = arith.constant 0.000000e+00 : f32
    %7 = vector.broadcast %cst_5 : f32 to vector<8x32xf32>
    %8 = arith.maximumf %6, %7 : vector<8x32xf32>
    %c0_6 = arith.constant 0 : index
    %c0_7 = arith.constant 0 : index
    %9 = vector.load %arg4[%c0_6, %c0_7] : memref<32x32xbf16, #tpu.memory_space<vmem>>, vector<32x32xbf16>
    %c0_8 = arith.constant 0 : index
    %c0_9 = arith.constant 0 : index
    %10 = vector.load %arg5[%c0_8, %c0_9] : memref<1x32xf32, #tpu.memory_space<vmem>>, vector<1x32xf32>
    %11 = arith.truncf %8 : vector<8x32xf32> to vector<8x32xbf16>
    %cst_10 = arith.constant dense<0.000000e+00> : vector<8x32xf32>
    %12 = tpu.matmul %11, %9, %cst_10 {dimension_numbers = #tpu.dot_dimension_numbers<[1], [0], [0], [1], [0, 0, 1, 1], [], []>} : vector<8x32xbf16>, vector<32x32xbf16>, vector<8x32xf32> -> vector<8x32xf32>
    %13 = vector.broadcast %10 : vector<1x32xf32> to vector<8x32xf32>
    %14 = arith.addf %12, %13 : vector<8x32xf32>
    %cst_11 = arith.constant 0.000000e+00 : f32
    %15 = vector.broadcast %cst_11 : f32 to vector<8x32xf32>
    %16 = arith.maximumf %14, %15 : vector<8x32xf32>
    %c0_12 = arith.constant 0 : index
    %c0_13 = arith.constant 0 : index
    %17 = vector.load %arg6[%c0_12, %c0_13] : memref<32x8xbf16, #tpu.memory_space<vmem>>, vector<32x8xbf16>
    %c0_14 = arith.constant 0 : index
    %c0_15 = arith.constant 0 : index
    %18 = vector.load %arg7[%c0_14, %c0_15] : memref<1x8xf32, #tpu.memory_space<vmem>>, vector<1x8xf32>
    %19 = arith.truncf %16 : vector<8x32xf32> to vector<8x32xbf16>
    %cst_16 = arith.constant dense<0.000000e+00> : vector<8x8xf32>
    %20 = tpu.matmul %19, %17, %cst_16 {dimension_numbers = #tpu.dot_dimension_numbers<[1], [0], [0], [1], [0, 0, 1, 1], [], []>} : vector<8x32xbf16>, vector<32x8xbf16>, vector<8x8xf32> -> vector<8x8xf32>
    %21 = vector.broadcast %18 : vector<1x8xf32> to vector<8x8xf32>
    %22 = arith.addf %20, %21 : vector<8x8xf32>
    %cst_17 = arith.constant 0.000000e+00 : f32
    %23 = vector.broadcast %cst_17 : f32 to vector<8x8xf32>
    %24 = arith.maximumf %22, %23 : vector<8x8xf32>
    %c0_18 = arith.constant 0 : index
    %c0_19 = arith.constant 0 : index
    %25 = vector.load %arg8[%c0_18, %c0_19] : memref<8x8xf32, #tpu.memory_space<vmem>>, vector<8x8xf32>
    tpu.vector_store %arg8[%c0_18, %c0_19], %24 {strides = array<i32>} : memref<8x8xf32, #tpu.memory_space<vmem>>, vector<8x8xf32>,
    return
  }
  func.func @transform_0(%arg0: i32) -> (i32, i32) {
    %c0_i32 = arith.constant 0 : i32
    %c0_i32_0 = arith.constant 0 : i32
    return %arg0, %c0_i32 : i32, i32
  }
  func.func @transform_1(%arg0: i32) -> (i32, i32) {
    %c0_i32 = arith.constant 0 : i32
    %c0_i32_0 = arith.constant 0 : i32
    %c0_i32_1 = arith.constant 0 : i32
    return %c0_i32, %c0_i32_0 : i32, i32
  }
  func.func @transform_2(%arg0: i32) -> (i32, i32) {
    %c0_i32 = arith.constant 0 : i32
    %c0_i32_0 = arith.constant 0 : i32
    %c0_i32_1 = arith.constant 0 : i32
    return %c0_i32, %c0_i32_0 : i32, i32
  }
  func.func @transform_3(%arg0: i32) -> (i32, i32) {
    %c0_i32 = arith.constant 0 : i32
    %c0_i32_0 = arith.constant 0 : i32
    %c0_i32_1 = arith.constant 0 : i32
    return %c0_i32, %c0_i32_0 : i32, i32
  }
  func.func @transform_4(%arg0: i32) -> (i32, i32) {
    %c0_i32 = arith.constant 0 : i32
    %c0_i32_0 = arith.constant 0 : i32
    %c0_i32_1 = arith.constant 0 : i32
    return %c0_i32, %c0_i32_0 : i32, i32
  }
  func.func @transform_5(%arg0: i32) -> (i32, i32) {
    %c0_i32 = arith.constant 0 : i32
    %c0_i32_0 = arith.constant 0 : i32
    %c0_i32_1 = arith.constant 0 : i32
    return %c0_i32, %c0_i32_0 : i32, i32
  }
  func.func @transform_6(%arg0: i32) -> (i32, i32) {
    %c0_i32 = arith.constant 0 : i32
    %c0_i32_0 = arith.constant 0 : i32
    %c0_i32_1 = arith.constant 0 : i32
    return %c0_i32, %c0_i32_0 : i32, i32
  }
  func.func @transform_7(%arg0: i32) -> (i32, i32) {
    %c0_i32 = arith.constant 0 : i32
    %c0_i32_0 = arith.constant 0 : i32
    return %arg0, %c0_i32 : i32, i32
  }
}

</mosaic_0001>

<bundles_post_ra>
// kernel: deepsurv_forward.1
= control target key start
LH: loop header
LB: loop body
LE: loop exit
PB: predicated region body
PF: predicated region fallthrough
CT: control target
= control target key end

     0   :  { %12 = vsyncpa [#allocation3], 0  ;;  %s318_s24 = smov [#allocation2]   ;;  %s400_s0 = inlined_call_operand.vmem [shape: f32[8,16], index: 0, kind: input, shape index: {}]   ;;  %s401_s1 = inlined_call_operand.vmem [shape: bf16[16,32], index: 1, kind: input, shape index: {}]   ;;  %s402_s2 = inlined_call_operand.vmem [shape: f32[1,32], index: 2, kind: input, shape index: {}]   ;;  %s403_s3 = inlined_call_operand.vmem [shape: bf16[32,32], index: 3, kind: input, shape index: {}]   ;;  %s404_s4 = inlined_call_operand.vmem [shape: f32[1,32], index: 4, kind: input, shape index: {}]   ;;  %s405_s5 = inlined_call_operand.vmem [shape: bf16[32,8], index: 5, kind: input, shape index: {}]   ;;  %s406_s6 = inlined_call_operand.hbm [shape: f32[1,8], index: 6, kind: input, shape index: {}]   ;;  %s407_s7 = inlined_call_operand.vmem [shape: f32[8,8], index: 7, kind: output, shape index: {}]  }
   0x1   :  { %s31_s25 = sshll.u32 %s318_s24, 4  ;;  %s294_s28 = scalar_lea.hbm %s406_s6, 16  ;;  %s32_s25 = int_to_ptr.vmem [resolvable:$true] %s31_s25 }
   0x2   :  { %p295_p0 = scmp.ne.s32.totalorder %s406_s6, %s294_s28  ;;  %p298_p1 = scmp.lt.u32.totalorder %s294_s28, %s406_s6 }
   0x4   :  { %p300_p2 = pnand %p298_p1, %p295_p0 }
   0x6   :  { %303 = shalt.err (!%p300_p2)
}
   0x7   :  { %s304_s10 = scalar_lea.vmem %s32_s25, 16  ;;  %s308_s11 = scalar_lea.vmem %s32_s25, 32 }
   0x8   :  { %p305_p3 = scmp.ne.s32.totalorder %s32_s25, %s304_s10  ;;  %p309_p4 = scmp.lt.s32.totalorder %s32_s25, %s32_s25 }
   0x9   :  { %p310_p5 = scmp.lt.s32.totalorder %s308_s11, %s304_s10 }
   0xb   :  { %p311_p6 = por %p310_p5, %p309_p4 }
   0xd   :  { %p312_p7 = pnand %p311_p6, %p305_p3 }
   0xf   :  { %315 = shalt.err (!%p312_p7)
}
  0x10   :  { %34 = dma.hbm_to_vmem [thread:$0]  %s406_s6, 16, %s32_s25, [#allocation3]  }
  0x11   :  { %316 = dma.done.wait [#allocation3], 16  }
  0x12   :  { %317 = vsyncadd [#allocation3], 4294967280  ;;  %v319_v0 = vmov 0.0   ;;  %vm320_vm0 = vmmov 0   ;;  %v289_v1 = vld [vmem:[%s401_s1] sm:$0xff]   ;;  %vm56_vm1 = vcmask 130048  }
  0x13   :  { %264 = vmatprep.subr.bf16.mxu0 %v319_v0  ;;  %266 = vmatprep.mubr.msk.bf16.mxu0 %vm320_vm0, %v319_v0  ;;  %v39_v2 = vld [vmem:[%s400_s0] sm:$0xff]  ;;  %v291_v5 = vld [vmem:[%s403_s3 + $0x8] sm:$0xff]   ;;  %vm125_vm2 = vcmask 261120   ;;  %vm238_vm3 = vcmask 64512  }
  0x14   :  { %270 = vmatprep.subr.bf16.mxu1 %v319_v0  ;;  %274 = vmatprep.mubr.msk.bf16.mxu1 %vm320_vm0, %v319_v0  ;;  %v43_v3 = vpack.c.bf16 %v39_v2, %v39_v2  ;;  %v290_v4 = vld [vmem:[%s403_s3] sm:$0xff]   ;;  %v293_v15 = vld [vmem:[%s405_s5 + $0x8] sm:$0xff]  }
  0x15   :  { %265 = vmatpush3.bf16.msra.mxu0 %v289_v1  ;;  %271 = vmatpush3.bf16.msra.mxu1 %v290_v4  ;;  %v292_v6 = vld [vmem:[%s405_s5] sm:$0xff]  }
  0x16   :  { %278 = vmatprep.subr.bf16.mxu0 %v319_v0  ;;  %272 = vmatprep.subr.bf16.mxu1 %v319_v0  ;;  %v245_v7 = vld [vmem:[%s402_s2] ss:$0 sm:$0xff] }
  0x17   :  { %v248_v16 = vld [vmem:[%s404_s4] ss:$0 sm:$0xff] }
  0x18   :  { %267 = vmatmul.mubr.msk.bf16.vlgmr.msra.gmra.mrb[0].mxu0 %vm56_vm1, %v43_v3  ;;  %v252_v24 = vld [vmem:[#allocation2] ss:$0 sm:$0xff] }
  0x19   :  { %282 = vmatprep.mubr.msk.bf16.mxu0 %vm320_vm0, %v319_v0  ;;  %273 = vmatpush3.bf16.msra.mxu1 %v291_v5 }
  0x1a   :  { %279 = vmatpush3.bf16.msra.mxu0 %v292_v6 }
  0x1b   :  { %280 = vmatprep.subr.bf16.mxu0 %v319_v0 }
  0x1e   :  { %281 = vmatpush3.bf16.msra.mxu0 %v293_v15 }
  0xeb   :  { %v94_v8 = vpop.f32.mrb[0].mxu0 }
  0xec   :  { %v95_v9 = vadd.f32 %v245_v7, %v94_v8  ;;  %v268_v10 = vpop.f32.mrb[1].mxu0 }
  0xed   :  { %v97_v11 = vpop.f32.mrb[2].mxu0 }
  0xee   :  { %v100_v12 = vmax.f32 %v95_v9, 0.0  ;;  %v269_v13 = vpop.f32.mrb[3].mxu0 }
  0xf0   :  { %v106_v14 = vpack.c.bf16 %v100_v12, %v100_v12 }
  0xf2   :  { %275 = vmatmul.mubr.msk.bf16.vlgmr.msra.gmra.mrb[0].mxu1 %vm125_vm2, %v106_v14 }
 0x1c5   :  { %v163_v17 = vpop.f32.mrb[0].mxu1 }
 0x1c6   :  { %v164_v18 = vadd.f32 %v248_v16, %v163_v17  ;;  %v276_v19 = vpop.f32.mrb[1].mxu1 }
 0x1c7   :  { %v166_v20 = vpop.f32.mrb[2].mxu1 }
 0x1c8   :  { %v169_v21 = vmax.f32 %v164_v18, 0.0  ;;  %v277_v22 = vpop.f32.mrb[3].mxu1 }
 0x1ca   :  { %v175_v23 = vpack.c.bf16 %v169_v21, %v169_v21 }
 0x1cc   :  { %283 = vmatmul.mubr.msk.bf16.vlgmr.msra.gmra.mrb[4].mxu0 %vm125_vm2, %v175_v23 }
 0x29f   :  { %v231_v25 = vpop.f32.mrb[4].mxu0 }
 0x2a0   :  { %v232_v26 = vadd.f32 %v252_v24, %v231_v25  ;;  %v284_v27 = vpop.f32.mrb[5].mxu0 }
 0x2a1   :  { %v234_v28 = vpop.f32.mrb[6].mxu0 }
 0x2a2   :  { %v237_v29 = vmax.f32 %v232_v26, 0.0  ;;  %v285_v30 = vpop.f32.mrb[7].mxu0 }
 0x2a4   :  { %239 = vst.msk [vmem:[%s407_s7] sm:$0xff] %vm238_vm3, %v237_v29 }
 0x2a5   :  { %244 = vsyncpa [#allocation3], 1 }

</bundles_post_ra>
